<compile_context>
chip_gen: v7x
topology: tpu7x:2x2x1
jax: 0.10.0
libtpu: 0.0.40
codegen_flags: <defaults>
</compile_context>

<pallas_src>
import functools

import jax
import jax.numpy as jnp
from jax import lax
from jax.experimental import pallas as pl
from jax.experimental.pallas import tpu as pltpu

BN_EPS = 1e-5
_LANE = 128
_SUBLANE = 8


def _cdiv(a, b):
    return -(-a // b)


def _round_up(x, m):
    return _cdiv(x, m) * m


def _conv_stats_kernel(p_ref, w_ref, acc_ref):
    """Pass 1: conv tile (bf16 MXU, f32 accum) + per-core channel sum / sum-sq."""
    y = jnp.dot(p_ref[...], w_ref[...], preferred_element_type=jnp.float32)

    @pl.when(pl.program_id(1) == 0)           # first tile of this core's slice
    def _():
        acc_ref[...] = jnp.zeros_like(acc_ref)

    s = jnp.sum(y, axis=0, keepdims=True)      # (1, C_pad)
    sq = jnp.sum(y * y, axis=0, keepdims=True)  # (1, C_pad)
    acc_ref[...] += jnp.concatenate([s, sq], axis=0)[None]   # (1, 2, C_pad)


def _conv_affine_relu_kernel(p_ref, w_ref, scale_ref, shift_ref, o_ref):
    """Pass 2: recompute conv tile, apply folded BN scale/shift + ReLU, store bf16."""
    y = jnp.dot(p_ref[...], w_ref[...], preferred_element_type=jnp.float32)
    o_ref[...] = jnp.maximum(y * scale_ref[...] + shift_ref[...], 0.0).astype(o_ref.dtype)


def conv_block_forward(x_nchw, weight, bias, gamma, beta, *, tile_m=None):
    """x_nchw: (N, C_in, H, W); weight: (C_out, C_in, 3, 3); bias/gamma/beta: (C_out,)"""
    N, C_in, H, W = x_nchw.shape
    C_out = weight.shape[0]
    assert H >= 2 and W >= 2, "reflect padding with pad=1 needs H, W >= 2"
    M = N * H * W
    K = 9 * C_in
    K_used = _round_up(K, _SUBLANE)            # tiny sublane-friendly pad only
    # Full C_pad is presented as ONE block, so for real workloads (C_out >= 256)
    # the MXU N dimension is already >= 256 on v6e/v7x.
    C_pad = _round_up(C_out, _LANE)

    # ---- generation-aware VMEM budget (64 MiB on v7x, 128 MiB on v5e/v6e) ----
    try:
        vmem_cap = int(pltpu.get_tpu_info().vmem_capacity_bytes)
    except Exception:
        vmem_cap = 64 * 1024 * 1024            # conservative fallback
    vmem_limit = min(int(vmem_cap * 3 // 4), 96 * 1024 * 1024)
    tile_budget = vmem_cap // 4                # double-buffered working-set target

    # ---- glue: NHWC, reflect pad, im2col patches in bf16 (see TODO above) ----
    x = jnp.transpose(x_nchw, (0, 2, 3, 1))                               # NHWC
    xp = jnp.pad(x, ((0, 0), (1, 1), (1, 1), (0, 0)),
                 mode="reflect").astype(jnp.bfloat16)
    taps = [xp[:, kh:kh + H, kw:kw + W, :] for kh in range(3) for kw in range(3)]
    if K_used > K:                             # fold the small K pad into the concat
        taps.append(jnp.zeros((N, H, W, K_used - K), jnp.bfloat16))
    patches = jnp.concatenate(taps, axis=-1).reshape(M, K_used)           # bf16

    # ---- tile size: fill the VMEM budget, then re-balance tiles over M ----
    # per-row VMEM: double-buffered bf16 patch row + double-buffered bf16 output row
    per_row = 2 * (K_used * 2) + 2 * (C_pad * 2)
    fixed = 2 * K_used * C_pad * 2 + 16 * C_pad * 4   # (db) weight + stat/scale rows
    if tile_m is None:
        tile_m = max(_SUBLANE, (tile_budget - fixed) // per_row)
    tile_target = max(16, (int(tile_m) // 16) * 16)
    num_tiles0 = _cdiv(M, tile_target)
    num_cores = 2 if num_tiles0 >= 2 else 1           # megacore split of the stats pass
    tiles_per_core = _cdiv(num_tiles0, num_cores)
    num_tiles = num_cores * tiles_per_core
    tile_m = _round_up(_cdiv(M, num_tiles), 16)
    M_pad = num_tiles * tile_m

    if M_pad > M:
        # zero rows contribute exactly 0 to the conv output and to the BN stats
        patches = jnp.concatenate(
            [patches, jnp.zeros((M_pad - M, K_used), jnp.bfloat16)], axis=0)

    # weight -> (kh, kw, c_in, c_out) -> (K, C_out) matching the tap ordering
    w_mat = jnp.transpose(weight, (2, 3, 1, 0)).reshape(K, C_out)
    w_mat = jnp.pad(w_mat, ((0, K_used - K), (0, C_pad - C_out))).astype(jnp.bfloat16)

    gamma_row = jnp.pad(gamma.astype(jnp.float32), (0, C_pad - C_out)).reshape(1, C_pad)
    beta_row = jnp.pad(beta.astype(jnp.float32), (0, C_pad - C_out)).reshape(1, C_pad)
    del bias  # exactly cancelled by train-mode BN mean subtraction

    matmul_flops = 2 * M_pad * K_used * C_pad
    patch_bytes = M_pad * K_used * 2
    w_bytes = K_used * C_pad * 2

    # ---- pass 1: conv + per-core per-channel sum / sum-of-squares ----
    acc = pl.pallas_call(
        _conv_stats_kernel,
        out_shape=jax.ShapeDtypeStruct((num_cores, 2, C_pad), jnp.float32),
        grid=(num_cores, tiles_per_core),
        in_specs=[
            pl.BlockSpec((tile_m, K_used), lambda c, i: (c * tiles_per_core + i, 0)),
            pl.BlockSpec((K_used, C_pad), lambda c, i: (0, 0)),
        ],
        out_specs=pl.BlockSpec((1, 2, C_pad), lambda c, i: (c, 0, 0)),
        compiler_params=pltpu.CompilerParams(
            dimension_semantics=("parallel", "arbitrary"),
            vmem_limit_bytes=vmem_limit),
        cost_estimate=pl.CostEstimate(
            flops=matmul_flops + 3 * M_pad * C_pad,
            transcendentals=0,
            bytes_accessed=patch_bytes + w_bytes + num_cores * 2 * C_pad * 4),
    )(patches, w_mat)

    # fold BN (batch stats) into per-channel scale/shift, all f32 (tiny, plain JAX)
    sum_row = jnp.sum(acc[:, 0, :], axis=0, keepdims=True)
    sq_row = jnp.sum(acc[:, 1, :], axis=0, keepdims=True)
    mean = sum_row / M
    # TODO(synk): E[y^2] - E[y]^2 can cancel for very large M / large activations;
    # switch to a sum-of-squared-deviations pass if production scales demand it.
    var = jnp.maximum(sq_row / M - mean * mean, 0.0)
    scale = gamma_row * lax.rsqrt(var + BN_EPS)
    shift = beta_row - mean * scale

    # ---- pass 2: recompute conv per tile, apply scale/shift + ReLU, bf16 out ----
    y_flat = pl.pallas_call(
        _conv_affine_relu_kernel,
        out_shape=jax.ShapeDtypeStruct((M_pad, C_pad), jnp.bfloat16),
        grid=(num_tiles,),
        in_specs=[
            pl.BlockSpec((tile_m, K_used), lambda i: (i, 0)),
            pl.BlockSpec((K_used, C_pad), lambda i: (0, 0)),
            pl.BlockSpec((1, C_pad), lambda i: (0, 0)),
            pl.BlockSpec((1, C_pad), lambda i: (0, 0)),
        ],
        out_specs=pl.BlockSpec((tile_m, C_pad), lambda i: (i, 0)),
        compiler_params=pltpu.CompilerParams(
            dimension_semantics=("parallel",),           # independent tiles -> megacore
            vmem_limit_bytes=vmem_limit),
        cost_estimate=pl.CostEstimate(
            flops=matmul_flops + 3 * M_pad * C_pad,
            transcendentals=0,
            bytes_accessed=patch_bytes + w_bytes + 2 * C_pad * 4 + M_pad * C_pad * 2),
    )(patches, w_mat, scale, shift)

    # TODO(synk): if the surrounding network consumes NHWC, return `y` directly and
    # skip this transpose (saves a full activation HBM round trip).
    y = y_flat[:M, :C_out].reshape(N, H, W, C_out)
    return jnp.transpose(y, (0, 3, 1, 2))                                 # NCHW, bf16


def _reference_forward(x_nchw, weight, bias, gamma, beta):
    """Pure-JAX reference (bf16 conv inputs, f32 accumulation) for validation."""
    N, C_in, H, W = x_nchw.shape
    C_out = weight.shape[0]
    x = jnp.transpose(x_nchw, (0, 2, 3, 1))
    xp = jnp.pad(x, ((0, 0), (1, 1), (1, 1), (0, 0)), mode="reflect")
    w_hwio = jnp.transpose(weight, (2, 3, 1, 0))
    y = lax.conv_general_dilated(
        xp.astype(jnp.bfloat16), w_hwio.astype(jnp.bfloat16),
        window_strides=(1, 1), padding="VALID",
        dimension_numbers=("NHWC", "HWIO", "NHWC"),
        preferred_element_type=jnp.float32)
    y = y + bias.reshape(1, 1, 1, C_out).astype(jnp.float32)
    mean = jnp.mean(y, axis=(0, 1, 2), keepdims=True)
    var = jnp.mean((y - mean) ** 2, axis=(0, 1, 2), keepdims=True)
    y = (y - mean) * lax.rsqrt(var + BN_EPS) * gamma.reshape(1, 1, 1, C_out) \
        + beta.reshape(1, 1, 1, C_out)
    return jnp.transpose(jnp.maximum(y, 0.0), (0, 3, 1, 2))


if __name__ == "__main__":
    key = jax.random.PRNGKey(0)
    k_x, k_w, k_b = jax.random.split(key, 3)

    N, C_in, C_out, H, W = 2, 4, 8, 16, 16
    x = jax.random.normal(k_x, (N, C_in, H, W), dtype=jnp.float32)

    # Deterministic synthetic parameters (shapes per nn.Conv2d / nn.BatchNorm2d init).
    fan_in = C_in * 3 * 3
    weight = jax.random.uniform(k_w, (C_out, C_in, 3, 3), jnp.float32,
                                minval=-1.0, maxval=1.0) / jnp.sqrt(fan_in)
    bias = jax.random.uniform(k_b, (C_out,), jnp.float32,
                              minval=-1.0, maxval=1.0) / jnp.sqrt(fan_in)
    gamma = jnp.ones((C_out,), jnp.float32)    # BN weight default
    beta = jnp.zeros((C_out,), jnp.float32)    # BN bias default

    # tile_m=128 so the toy shape exercises multi-tile pipelining, cross-tile BN
    # stat accumulation and the 2-way (megacore) stats split.
    fwd = jax.jit(functools.partial(conv_block_forward, tile_m=128))
    out = jax.block_until_ready(fwd(x, weight, bias, gamma, beta))

    ref = jax.block_until_ready(_reference_forward(x, weight, bias, gamma, beta))
    assert out.shape == (N, C_out, H, W)
    out_f32 = out.astype(jnp.float32)
    max_diff = float(jnp.max(jnp.abs(out_f32 - ref)))
    # kernel emits bf16 activations; tolerance covers the final bf16 rounding.
    assert jnp.allclose(out_f32, ref, atol=2e-2, rtol=2e-2), \
        f"mismatch vs reference: max abs diff = {max_diff:e}"

    print("KERNEL_OK")
</pallas_src>

<mosaic_0001>
module attributes {stable_mosaic.version = 11 : i64} {
  func.func @_conv_stats_kernel(%arg0: i32, %arg1: i32, %arg2: memref<128x40xbf16, #tpu.memory_space<vmem>>, %arg3: memref<40x128xbf16, #tpu.memory_space<vmem>>, %arg4: memref<1x2x128xf32, #tpu.memory_space<vmem>>) attributes {dimension_semantics = [#tpu.dimension_semantics<parallel>, #tpu.dimension_semantics<arbitrary>], iteration_bounds = array<i64: 2, 2>, scalar_prefetch = 0 : i64, scratch_operands = 0 : i64, tpu.core_type = #tpu.core_type<tc>, window_params = [{transform_indices = @transform_0, window_bounds = array<i64: 128, 40>}, {pipeline_mode = #tpu.pipeline_mode<synchronous>, transform_indices = @transform_1, window_bounds = array<i64: 40, 128>}, {transform_indices = @transform_2, window_bounds = array<i64: 1, 2, 128>}]} {
    %c0 = arith.constant 0 : index
    %c0_0 = arith.constant 0 : index
    %0 = vector.load %arg2[%c0, %c0_0] : memref<128x40xbf16, #tpu.memory_space<vmem>>, vector<128x40xbf16>
    %c0_1 = arith.constant 0 : index
    %c0_2 = arith.constant 0 : index
    %1 = vector.load %arg3[%c0_1, %c0_2] : memref<40x128xbf16, #tpu.memory_space<vmem>>, vector<40x128xbf16>
    %cst = arith.constant dense<0.000000e+00> : vector<128x128xf32>
    %2 = tpu.matmul %0, %1, %cst {dimension_numbers = #tpu.dot_dimension_numbers<[1], [0], [0], [1], [0, 0, 1, 1], [], []>} : vector<128x40xbf16>, vector<40x128xbf16>, vector<128x128xf32> -> vector<128x128xf32>
    %c0_i32 = arith.constant 0 : i32
    %3 = arith.cmpi eq, %arg1, %c0_i32 : i32
    %4 = arith.extui %3 : i1 to i32
    %c0_i32_3 = arith.constant 0 : i32
    %5 = arith.cmpi ne, %4, %c0_i32_3 : i32
    scf.if %5 {
      %cst_12 = arith.constant 0.000000e+00 : f32
      %16 = vector.broadcast %cst_12 : f32 to vector<1x2x128xf32>
      %c0_13 = arith.constant 0 : index
      %c0_14 = arith.constant 0 : index
      %c0_15 = arith.constant 0 : index
      %17 = vector.load %arg4[%c0_13, %c0_14, %c0_15] : memref<1x2x128xf32, #tpu.memory_space<vmem>>, vector<1x2x128xf32>
      tpu.vector_store %arg4[%c0_13, %c0_14, %c0_15], %16 {strides = array<i32>} : memref<1x2x128xf32, #tpu.memory_space<vmem>>, vector<1x2x128xf32>,
    } else {
    }
    %cst_4 = arith.constant dense<0.000000e+00> : vector<128xf32>
    %6 = vector.multi_reduction <add>, %2, %cst_4 [0] : vector<128x128xf32> to vector<128xf32>
    %7 = vector.shape_cast %6 : vector<128xf32> to vector<1x128xf32>
    %8 = arith.mulf %2, %2 : vector<128x128xf32>
    %cst_5 = arith.constant dense<0.000000e+00> : vector<128xf32>
    %9 = vector.multi_reduction <add>, %8, %cst_5 [0] : vector<128x128xf32> to vector<128xf32>
    %10 = vector.shape_cast %9 : vector<128xf32> to vector<1x128xf32>
    %c0_6 = arith.constant 0 : index
    %c0_7 = arith.constant 0 : index
    %c0_8 = arith.constant 0 : index
    %11 = vector.load %arg4[%c0_6, %c0_7, %c0_8] : memref<1x2x128xf32, #tpu.memory_space<vmem>>, vector<1x2x128xf32>
    %12 = tpu.concatenate %7, %10 in 0 : vector<1x128xf32>, vector<1x128xf32> -> vector<2x128xf32>
    %13 = vector.shape_cast %12 : vector<2x128xf32> to vector<1x2x128xf32>
    %14 = arith.addf %11, %13 : vector<1x2x128xf32>
    %c0_9 = arith.constant 0 : index
    %c0_10 = arith.constant 0 : index
    %c0_11 = arith.constant 0 : index
    %15 = vector.load %arg4[%c0_9, %c0_10, %c0_11] : memref<1x2x128xf32, #tpu.memory_space<vmem>>, vector<1x2x128xf32>
    tpu.vector_store %arg4[%c0_9, %c0_10, %c0_11], %14 {strides = array<i32>} : memref<1x2x128xf32, #tpu.memory_space<vmem>>, vector<1x2x128xf32>,
    return
  }
  func.func @transform_0(%arg0: i32, %arg1: i32) -> (i32, i32) {
    %c2_i32 = arith.constant 2 : i32
    %0 = arith.muli %arg0, %c2_i32 : i32
    %1 = arith.addi %0, %arg1 : i32
    %c0_i32 = arith.constant 0 : i32
    %c0_i32_0 = arith.constant 0 : i32
    return %1, %c0_i32 : i32, i32
  }
  func.func @transform_1(%arg0: i32, %arg1: i32) -> (i32, i32) {
    %c0_i32 = arith.constant 0 : i32
    %c0_i32_0 = arith.constant 0 : i32
    %c0_i32_1 = arith.constant 0 : i32
    return %c0_i32, %c0_i32_0 : i32, i32
  }
  func.func @transform_2(%arg0: i32, %arg1: i32) -> (i32, i32, i32) {
    %c0_i32 = arith.constant 0 : i32
    %c0_i32_0 = arith.constant 0 : i32
    %c0_i32_1 = arith.constant 0 : i32
    return %arg0, %c0_i32, %c0_i32_0 : i32, i32, i32
  }
}

module attributes {stable_mosaic.version = 11 : i64} {
  func.func @_conv_affine_relu_kernel(%arg0: i32, %arg1: memref<128x40xbf16, #tpu.memory_space<vmem>>, %arg2: memref<40x128xbf16, #tpu.memory_space<vmem>>, %arg3: memref<1x128xf32, #tpu.memory_space<vmem>>, %arg4: memref<1x128xf32, #tpu.memory_space<vmem>>, %arg5: memref<128x128xbf16, #tpu.memory_space<vmem>>) attributes {dimension_semantics = [#tpu.dimension_semantics<parallel>], iteration_bounds = array<i64: 4>, scalar_prefetch = 0 : i64, scratch_operands = 0 : i64, tpu.core_type = #tpu.core_type<tc>, window_params = [{transform_indices = @transform_0, window_bounds = array<i64: 128, 40>}, {pipeline_mode = #tpu.pipeline_mode<synchronous>, transform_indices = @transform_1, window_bounds = array<i64: 40, 128>}, {pipeline_mode = #tpu.pipeline_mode<synchronous>, transform_indices = @transform_2, window_bounds = array<i64: 1, 128>}, {pipeline_mode = #tpu.pipeline_mode<synchronous>, transform_indices = @transform_3, window_bounds = array<i64: 1, 128>}, {transform_indices = @transform_4, window_bounds = array<i64: 128, 128>}]} {
    %c0 = arith.constant 0 : index
    %c0_0 = arith.constant 0 : index
    %0 = vector.load %arg1[%c0, %c0_0] : memref<128x40xbf16, #tpu.memory_space<vmem>>, vector<128x40xbf16>
    %c0_1 = arith.constant 0 : index
    %c0_2 = arith.constant 0 : index
    %1 = vector.load %arg2[%c0_1, %c0_2] : memref<40x128xbf16, #tpu.memory_space<vmem>>, vector<40x128xbf16>
    %cst = arith.constant dense<0.000000e+00> : vector<128x128xf32>
    %2 = tpu.matmul %0, %1, %cst {dimension_numbers = #tpu.dot_dimension_numbers<[1], [0], [0], [1], [0, 0, 1, 1], [], []>} : vector<128x40xbf16>, vector<40x128xbf16>, vector<128x128xf32> -> vector<128x128xf32>
    %c0_3 = arith.constant 0 : index
    %c0_4 = arith.constant 0 : index
    %3 = vector.load %arg3[%c0_3, %c0_4] : memref<1x128xf32, #tpu.memory_space<vmem>>, vector<1x128xf32>
    %4 = vector.broadcast %3 : vector<1x128xf32> to vector<128x128xf32>
    %5 = arith.mulf %2, %4 : vector<128x128xf32>
    %c0_5 = arith.constant 0 : index
    %c0_6 = arith.constant 0 : index
    %6 = vector.load %arg4[%c0_5, %c0_6] : memref<1x128xf32, #tpu.memory_space<vmem>>, vector<1x128xf32>
    %7 = vector.broadcast %6 : vector<1x128xf32> to vector<128x128xf32>
    %8 = arith.addf %5, %7 : vector<128x128xf32>
    %cst_7 = arith.constant 0.000000e+00 : f32
    %9 = vector.broadcast %cst_7 : f32 to vector<128x128xf32>
    %10 = arith.maximumf %8, %9 : vector<128x128xf32>
    %11 = arith.truncf %10 : vector<128x128xf32> to vector<128x128xbf16>
    %c0_8 = arith.constant 0 : index
    %c0_9 = arith.constant 0 : index
    %12 = vector.load %arg5[%c0_8, %c0_9] : memref<128x128xbf16, #tpu.memory_space<vmem>>, vector<128x128xbf16>
    tpu.vector_store %arg5[%c0_8, %c0_9], %11 {strides = array<i32>} : memref<128x128xbf16, #tpu.memory_space<vmem>>, vector<128x128xbf16>,
    return
  }
  func.func @transform_0(%arg0: i32) -> (i32, i32) {
    %c0_i32 = arith.constant 0 : i32
    %c0_i32_0 = arith.constant 0 : i32
    return %arg0, %c0_i32 : i32, i32
  }
  func.func @transform_1(%arg0: i32) -> (i32, i32) {
    %c0_i32 = arith.constant 0 : i32
    %c0_i32_0 = arith.constant 0 : i32
    %c0_i32_1 = arith.constant 0 : i32
    return %c0_i32, %c0_i32_0 : i32, i32
  }
  func.func @transform_2(%arg0: i32) -> (i32, i32) {
    %c0_i32 = arith.constant 0 : i32
    %c0_i32_0 = arith.constant 0 : i32
    %c0_i32_1 = arith.constant 0 : i32
    return %c0_i32, %c0_i32_0 : i32, i32
  }
  func.func @transform_3(%arg0: i32) -> (i32, i32) {
    %c0_i32 = arith.constant 0 : i32
    %c0_i32_0 = arith.constant 0 : i32
    %c0_i32_1 = arith.constant 0 : i32
    return %c0_i32, %c0_i32_0 : i32, i32
  }
  func.func @transform_4(%arg0: i32) -> (i32, i32) {
    %c0_i32 = arith.constant 0 : i32
    %c0_i32_0 = arith.constant 0 : i32
    return %arg0, %c0_i32 : i32, i32
  }
}

</mosaic_0001>

<bundles_post_ra>
// kernel: conv_block_forward.2
= control target key start
LH: loop header
LB: loop body
LE: loop exit
PB: predicated region body
PF: predicated region fallthrough
CT: control target
= control target key end

     0   :  { %s687_s9 = smov 0   ;;  %s689_s10 = smov 0   ;;  %s769_s0 = inlined_call_operand.vmem [shape: bf16[512,40], index: 0, kind: input, shape index: {}]   ;;  %s770_s1 = inlined_call_operand.vmem [shape: bf16[40,128], index: 1, kind: input, shape index: {}]   ;;  %s771_s2 = inlined_call_operand.vmem [shape: f32[2,2,128], index: 2, kind: output, shape index: {}]  }
   0x1   :  { %s691_s11 = smov 0   ;;  %s693_s12 = smov 0  }
   0x2   :  { %s695_s13 = smov 0  }
   0x3 LB: > { %s21_s14 = sadd.s32 1, %s661_s11  ;;  %s24_s15 = sadd.s32 1, %s665_s12  ;;  %s669_s13 = sphi %s695_s13, %s12_s13   ;;  %s665_s12 = sphi %s693_s12, %s775_s12   ;;  %s661_s11 = sphi %s691_s11, %s774_s11   ;;  %s657_s10 = sphi %s689_s10, %s773_s10   ;;  %s653_s9 = sphi %s687_s9, %s772_s9  }
   0x4   : > { %p22_p0 = scmp.ge.s32.totalorder %s21_s14, 2  ;;  %p511_p1 = scmp.ge.s32.totalorder %s669_s13, 1 }
   0x5   : > { %p133_p2 = scmp.lt.s32.totalorder %s669_s13, 5 }
   0x6   : > { %s777_s14 = smov (%p22_p0, %s21_s14), 0  ;;  %s779_s15 = smov (!%p22_p0, %s24_s15), %s665_s12 }
   0x7   : > { %p134_p3 = pnand %p511_p1, %p133_p2  ;;  %p26_p4 = scmp.ge.s32.totalorder %s779_s15, 2 }
   0x8   : > { %p166_p5 = scmp.lt.s32.totalorder (!%p134_p3), %s657_s10, 1  ;;  %v620_v0 = vld [vmem:[%s770_s1] sm:$0xff] (!%p134_p3)   ;;  %v621_v1 = vld [vmem:[%s770_s1 + $0x8] sm:$0xff] (!%p134_p3)   ;;  %s512_s21 = sshll.u32 (!%p134_p3), %s657_s10, 1  ;;  %v622_v2 = vld [vmem:[%s770_s1 + $0x10] ss:$0 sps:$4 sm:$0xff] (!%p134_p3)  }
   0x9   : > { %s781_s15 = smov (%p26_p4, %s779_s15), 0  ;;  %137 = sbr.rel (%p134_p3) target bundleno = 294 (0x126), region = 28 }
   0xa   : > { %549 = vmatprep.subr.bf16.mxu0 (!%p134_p3), %v620_v0  ;;  %571 = vmatprep.subr.bf16.mxu1 (!%p134_p3), %v620_v0  ;;  %s157_s25 = sadd.s32 (!%p134_p3), %s653_s9, %s512_s21  ;;  %vm272_vm0 = vcmask (!%p134_p3), 1043456   ;;  %vm247_vm1 = vcmask (!%p134_p3), 326656   ;;  %p535_p7 = scmp.ne.s32.totalorder (!%p134_p3), %s653_s9, 0 }
   0xb   : > { %550 = vmatpush3.bf16.msra.mxu0 (!%p134_p3), %v620_v0  ;;  %574 = vmatpush3.bf16.msra.mxu1 (!%p134_p3), %v620_v0  ;;  %s513_s29 = sshll.u32 (!%p134_p3), %s157_s25, 4  ;;  %v274_v3 = vsel (!%p134_p3), %vm272_vm0, %v622_v2, 0 }
   0xc   : > { %551 = vmatprep.subr.bf16.mxu0 (!%p134_p3), %v621_v1  ;;  %572 = vmatprep.subr.bf16.mxu1 (!%p134_p3), %v621_v1  ;;  %p159_p6 = scmp.lt.s32.totalorder (!%p134_p3), %s513_s29, 63 }
   0xf   : > { %552 = vmatpush3.bf16.msra.mxu0 (!%p134_p3), %v621_v1  ;;  %575 = vmatpush3.bf16.msra.mxu1 (!%p134_p3), %v621_v1 }
  0x10   : > { %s167_s20 = scalar_select %p166_p5, %s657_s10, 1  ;;  %577 = vmatprep.subr.msk.bf16.mxu0 %vm272_vm0, %v622_v2  ;;  %578 = vmatprep.subr.msk.bf16.mxu1 %vm272_vm0, %v622_v2 }
  0x11   : > { %s783_s29 = smov (!%p159_p6, %s513_s29), 63  ;;  %v671_v28 = vmov (!%p535_p7), 0.0  }
  0x12   : > { %s515_s22 = sshll.u32 %s167_s20, 1  ;;  %s514_s30 = sshll.u32 %s783_s29, 2 }
  0x13   : > { %s737_s28 = scalar_lea.vmem %s771_s2, %s515_s22  ;;  %554 = vmatpush3.bf16.msra.mxu0 %v274_v3  ;;  %576 = vmatpush3.bf16.msra.mxu1 %v274_v3  ;;  %s162_s5 = scalar_lea.vmem %s769_s0, %s514_s30 }
  0x14   : > { %v623_v4 = vld [vmem:[%s162_s5] sm:$0xff]   ;;  %v625_v6 = vld [vmem:[%s162_s5 + $0x8] sm:$0xff]   ;;  %v627_v8 = vld [vmem:[%s162_s5 + $0x10] sm:$0xff]   ;;  %377 = vst [vmem:[%s737_s28] sm:$0x3] (!%p535_p7), %v671_v28 }
  0x15   : > { %v624_v5 = vld [vmem:[%s162_s5 + $0x20] sm:$0xff]   ;;  %555 = vmatprep.mubr.msk.bf16.mxu0 %vm247_vm1, %v623_v4  ;;  %v626_v7 = vld [vmem:[%s162_s5 + $0x28] sm:$0xff]   ;;  %v628_v9 = vld [vmem:[%s162_s5 + $0x30] sm:$0xff]  }
  0x16   : > { %563 = vmatprep.mubr.msk.bf16.mxu1 %vm247_vm1, %v624_v5  ;;  %556 = vmatmul.mubr.msk.bf16.vlgmr.msra.gmra.mrb[0].mxu0 %vm247_vm1, %v625_v6  ;;  %v629_v10 = vld [vmem:[%s162_s5 + $0x18] sm:$0xff]  }
  0x17   : > { %564 = vmatmul.mubr.msk.bf16.vlgmr.msra.gmra.mrb[0].mxu1 %vm247_vm1, %v626_v7  ;;  %559 = vmatprep.mubr.msk.bf16.mxu0 %vm247_vm1, %v627_v8  ;;  %v630_v11 = vld [vmem:[%s162_s5 + $0x38] sm:$0xff]  }
  0x18   : > { %567 = vmatprep.mubr.msk.bf16.mxu1 %vm247_vm1, %v628_v9 }
  0x1e   : > { %560 = vmatmul.mubr.msk.bf16.gmra.mrb[4].mxu0 %vm247_vm1, %v629_v10 }
  0x1f   : > { %568 = vmatmul.mubr.msk.bf16.gmra.mrb[4].mxu1 %vm247_vm1, %v630_v11 }
  0xe9   : > { %v557_v12 = vpop.f32.mrb[0].mxu0 }
  0xea   : > { %v565_v13 = vpop.f32.mrb[0].mxu1  ;;  %v310_v14 = vpop.f32.mrb[1].mxu0 }
  0xeb   : > { %v342_v15 = vpop.f32.mrb[1].mxu1  ;;  %v558_v16 = vpop.f32.mrb[2].mxu0 }
  0xec   : > { %v566_v17 = vpop.f32.mrb[2].mxu1  ;;  %v313_v18 = vpop.f32.mrb[3].mxu0 }
  0xed   : > { %v345_v19 = vpop.f32.mrb[3].mxu1 }
  0xef   : > { %376 = sbr.rel (%p535_p7) target bundleno = 246 (0xf6), region = 32 }
  0xf1   : > { %v561_v20 = vpop.f32.mrb[4].mxu0 }
  0xf2   : > { %v569_v21 = vpop.f32.mrb[4].mxu1  ;;  %v326_v22 = vpop.f32.mrb[5].mxu0 }
  0xf3   : > { %v358_v23 = vpop.f32.mrb[5].mxu1  ;;  %v562_v24 = vpop.f32.mrb[6].mxu0 }
  0xf4   : > { %v570_v25 = vpop.f32.mrb[6].mxu1  ;;  %v329_v26 = vpop.f32.mrb[7].mxu0 }
  0xf5   : > { %v361_v27 = vpop.f32.mrb[7].mxu1 }
  0xf6 PF: > { %v378_v29 = vadd.f32 %v313_v18, %v310_v14  ;;  %v399_v30 = vmul.f32 %v310_v14, %v310_v14  ;;  %v400_v31 = vmul.f32 %v313_v18, %v313_v18  ;;  %v401_v33 = vmul.f32 %v557_v12, %v557_v12 }
  0xf7   : > { %v402_v35 = vmul.f32 %v558_v16, %v558_v16  ;;  %v403_v38 = vmul.f32 %v326_v22, %v326_v22  ;;  %v404_v41 = vmul.f32 %v329_v26, %v329_v26  ;;  %v405_v44 = vmul.f32 %v561_v20, %v561_v20 }
  0xf8   : > { %v379_v32 = vadd.f32 %v557_v12, %v378_v29  ;;  %v415_v36 = vadd.f32 %v400_v31, %v399_v30  ;;  %v406_v47 = vmul.f32 %v562_v24, %v562_v24  ;;  %v407_v50 = vmul.f32 %v342_v15, %v342_v15 }
  0xf9   : > { %v408_v53 = vmul.f32 %v345_v19, %v345_v19  ;;  %v409_v56 = vmul.f32 %v565_v13, %v565_v13  ;;  %v410_v59 = vmul.f32 %v566_v17, %v566_v17  ;;  %v411_v62 = vmul.f32 %v358_v23, %v358_v23 }
  0xfa   : > { %v380_v34 = vadd.f32 %v558_v16, %v379_v32  ;;  %v416_v39 = vadd.f32 %v415_v36, %v401_v33  ;;  %v412_v1 = vmul.f32 %v361_v27, %v361_v27  ;;  %v413_v4 = vmul.f32 %v569_v21, %v569_v21 }
  0xfb   : > { %v414_v7 = vmul.f32 %v570_v25, %v570_v25  ;;  %vm437_vm2 = vcmask 1040384  }
  0xfc   : > { %v381_v37 = vadd.f32 %v380_v34, %v326_v22  ;;  %v417_v42 = vadd.f32 %v416_v39, %v402_v35 }
  0xfe   : > { %v382_v40 = vadd.f32 %v381_v37, %v329_v26  ;;  %v418_v45 = vadd.f32 %v417_v42, %v403_v38 }
 0x100   : > { %v383_v43 = vadd.f32 %v561_v20, %v382_v40  ;;  %v419_v48 = vadd.f32 %v418_v45, %v404_v41 }
 0x102   : > { %v384_v46 = vadd.f32 %v562_v24, %v383_v43  ;;  %v420_v51 = vadd.f32 %v419_v48, %v405_v44 }
 0x104   : > { %v385_v49 = vadd.f32 %v384_v46, %v342_v15  ;;  %v421_v54 = vadd.f32 %v420_v51, %v406_v47 }
 0x106   : > { %v386_v52 = vadd.f32 %v385_v49, %v345_v19  ;;  %v422_v57 = vadd.f32 %v421_v54, %v407_v50 }
 0x108   : > { %v387_v55 = vadd.f32 %v565_v13, %v386_v52  ;;  %v423_v60 = vadd.f32 %v422_v57, %v408_v53 }
 0x10a   : > { %v388_v58 = vadd.f32 %v566_v17, %v387_v55  ;;  %v424_v63 = vadd.f32 %v423_v60, %v409_v56 }
 0x10c   : > { %v389_v61 = vadd.f32 %v388_v58, %v358_v23  ;;  %v425_v2 = vadd.f32 %v424_v63, %v410_v59  ;;  %v436_v23 = vld [vmem:[%s737_s28] sm:$0x3] }
 0x10e   : > { %v390_v0 = vadd.f32 %v389_v61, %v361_v27  ;;  %v426_v5 = vadd.f32 %v425_v2, %v411_v62 }
 0x110   : > { %v391_v3 = vadd.f32 %v569_v21, %v390_v0  ;;  %v427_v8 = vadd.f32 %v426_v5, %v412_v1 }
 0x112   : > { %v392_v6 = vadd.f32 %v570_v25, %v391_v3  ;;  %v428_v10 = vadd.f32 %v427_v8, %v413_v4 }
 0x114   : > { %v393_v9 = vrot.slane %v392_v6, 4  ;;  %v429_v12 = vadd.f32 %v428_v10, %v414_v7 }
 0x116   : > { %v394_v11 = vadd.f32 %v393_v9, %v392_v6  ;;  %v430_v14 = vrot.slane %v429_v12, 4 }
 0x118   : > { %v395_v13 = vrot.slane %v394_v11, 2  ;;  %v431_v16 = vadd.f32 %v430_v14, %v429_v12 }
 0x11a   : > { %v396_v15 = vadd.f32 %v395_v13, %v394_v11  ;;  %v432_v18 = vrot.slane %v431_v16, 2 }
 0x11c   : > { %v397_v17 = vrot.slane %v396_v15, 1  ;;  %v433_v19 = vadd.f32 %v432_v18, %v431_v16 }
 0x11e   : > { %v398_v20 = vadd.f32 %v397_v17, %v396_v15  ;;  %v434_v22 = vrot.slane %v433_v19, 1 }
 0x120   : > { %v435_v21 = vadd.f32 %v434_v22, %v433_v19 }
 0x122   : > { %v438_v24 = vsel %vm437_vm2, %v398_v20, %v435_v21 }
 0x123   : > { %v439_v25 = vadd.f32 %v438_v24, %v436_v23 }
 0x125   : > { %440 = vst [vmem:[%s737_s28] sm:$0x3] %v439_v25 }
 0x126 PF: > { %s12_s13 = sadd.s32 1, %s669_s13   ;;  %s772_s9 = smov %s661_s11 }
 0x127   : > { %p9_p8 = scmp.ge.s32.totalorder %s12_s13, 6   ;;  %s773_s10 = smov %s665_s12 }
 0x128   : > { %s774_s11 = smov %s777_s14  ;;  %s775_s12 = smov %s781_s15 }
 0x129   :  { %11 = sbr.rel (!%p9_p8) target bundleno = 3 (0x3), region = 62 }

// kernel: conv_block_forward.3
= control target key start
LH: loop header
LB: loop body
LE: loop exit
PB: predicated region body
PF: predicated region fallthrough
CT: control target
= control target key end

     0   :  { %s806_s15 = smov 0   ;;  %s881_s0 = inlined_call_operand.vmem [shape: bf16[512,40], index: 0, kind: input, shape index: {}]   ;;  %s882_s1 = inlined_call_operand.vmem [shape: bf16[40,128], index: 1, kind: input, shape index: {}]   ;;  %s883_s2 = inlined_call_operand.vmem [shape: f32[1,128], index: 2, kind: input, shape index: {}]   ;;  %s884_s3 = inlined_call_operand.vmem [shape: f32[1,128], index: 3, kind: input, shape index: {}]   ;;  %s885_s4 = inlined_call_operand.vmem [shape: bf16[512,128], index: 4, kind: output, shape index: {}]  }
   0x1 LB: > { %s602_s16 = sadd.s32 4294967295, %s779_s15   ;;  %p606_p0 = scmp.ge.s32.totalorder %s779_s15, 1  ;;  %s779_s15 = sphi %s806_s15, %s14_s15  }
   0x2   : > { %p163_p1 = scmp.lt.s32.totalorder %s779_s15, 5 }
   0x4   : > { %p164_p2 = pnand %p606_p0, %p163_p1 }
   0x5   : > { %v762_v0 = vld [vmem:[%s882_s1] sm:$0xff] (!%p164_p2)   ;;  %v763_v1 = vld [vmem:[%s882_s1 + $0x8] sm:$0xff] (!%p164_p2)   ;;  %s607_s21 = sshll.u32 (!%p164_p2), %s602_s16, 4  ;;  %v764_v2 = vld [vmem:[%s882_s1 + $0x10] ss:$0 sps:$4 sm:$0xff] (!%p164_p2)   ;;  %vm303_vm0 = vcmask (!%p164_p2), 1043456  }
   0x6   : > { %167 = sbr.rel (%p164_p2) target bundleno = 251 (0xfb), region = 36  ;;  %724 = vmatprep.subr.bf16.mxu0 (!%p164_p2), %v762_v0  ;;  %746 = vmatprep.subr.bf16.mxu1 (!%p164_p2), %v762_v0  ;;  %p190_p3 = scmp.lt.s32.totalorder (!%p164_p2), %s607_s21, 63  ;;  %vm278_vm1 = vcmask (!%p164_p2), 326656   ;;  %v305_v3 = vsel (!%p164_p2), %vm303_vm0, %v764_v2, 0  ;;  %v630_v12 = vld [vmem:[%s883_s2] ss:$0 sm:$0xff] (!%p164_p2) }
   0x7   : > { %725 = vmatpush3.bf16.msra.mxu0 (!%p164_p2), %v762_v0  ;;  %749 = vmatpush3.bf16.msra.mxu1 (!%p164_p2), %v762_v0  ;;  %v845_v14 = vld [vmem:[%s884_s3] ss:$0 sm:$0xff] (!%p164_p2) }
   0x8   : > { %726 = vmatprep.subr.bf16.mxu0 (!%p164_p2), %v763_v1  ;;  %747 = vmatprep.subr.bf16.mxu1 (!%p164_p2), %v763_v1 }
   0xb   : > { %727 = vmatpush3.bf16.msra.mxu0 (!%p164_p2), %v763_v1  ;;  %750 = vmatpush3.bf16.msra.mxu1 (!%p164_p2), %v763_v1 }
   0xc   : > { %752 = vmatprep.subr.msk.bf16.mxu0 (!%p164_p2), %vm303_vm0, %v764_v2  ;;  %753 = vmatprep.subr.msk.bf16.mxu1 (!%p164_p2), %vm303_vm0, %v764_v2 }
   0xd   : > { %s887_s21 = smov (!%p190_p3, %s607_s21), 63 }
   0xe   : > { %s608_s24 = sshll.u32 %s887_s21, 2 }
   0xf   : > { %s193_s27 = scalar_lea.vmem %s881_s0, %s608_s24  ;;  %729 = vmatpush3.bf16.msra.mxu0 %v305_v3  ;;  %751 = vmatpush3.bf16.msra.mxu1 %v305_v3  ;;  %s860_s8 = scalar_lea.vmem %s885_s4, %s608_s24 }
  0x10   : > { %v765_v4 = vld [vmem:[%s193_s27] sm:$0xff]   ;;  %v767_v6 = vld [vmem:[%s193_s27 + $0x8] sm:$0xff]   ;;  %v769_v8 = vld [vmem:[%s193_s27 + $0x10] sm:$0xff]  }
  0x11   : > { %v766_v5 = vld [vmem:[%s193_s27 + $0x20] sm:$0xff]   ;;  %730 = vmatprep.mubr.msk.bf16.mxu0 %vm278_vm1, %v765_v4  ;;  %v768_v7 = vld [vmem:[%s193_s27 + $0x28] sm:$0xff]   ;;  %v770_v9 = vld [vmem:[%s193_s27 + $0x30] sm:$0xff]  }
  0x12   : > { %738 = vmatprep.mubr.msk.bf16.mxu1 %vm278_vm1, %v766_v5  ;;  %731 = vmatmul.mubr.msk.bf16.vlgmr.msra.gmra.mrb[0].mxu0 %vm278_vm1, %v767_v6  ;;  %v771_v10 = vld [vmem:[%s193_s27 + $0x18] sm:$0xff]  }
  0x13   : > { %739 = vmatmul.mubr.msk.bf16.vlgmr.msra.gmra.mrb[0].mxu1 %vm278_vm1, %v768_v7  ;;  %734 = vmatprep.mubr.msk.bf16.mxu0 %vm278_vm1, %v769_v8  ;;  %v772_v11 = vld [vmem:[%s193_s27 + $0x38] sm:$0xff]  }
  0x14   : > { %742 = vmatprep.mubr.msk.bf16.mxu1 %vm278_vm1, %v770_v9 }
  0x1a   : > { %735 = vmatmul.mubr.msk.bf16.gmra.mrb[4].mxu0 %vm278_vm1, %v771_v10 }
  0x1b   : > { %743 = vmatmul.mubr.msk.bf16.gmra.mrb[4].mxu1 %vm278_vm1, %v772_v11 }
  0xe5   : > { %v732_v13 = vpop.f32.mrb[0].mxu0 }
  0xe6   : > { %v740_v15 = vpop.f32.mrb[0].mxu1  ;;  %v413_v16 = vmul.f32 %v732_v13, %v630_v12  ;;  %v341_v18 = vpop.f32.mrb[1].mxu0 }
  0xe7   : > { %v421_v17 = vmul.f32 %v740_v15, %v630_v12  ;;  %v373_v19 = vpop.f32.mrb[1].mxu1  ;;  %v411_v20 = vmul.f32 %v630_v12, %v341_v18  ;;  %v733_v22 = vpop.f32.mrb[2].mxu0 }
  0xe8   : > { %v419_v21 = vmul.f32 %v630_v12, %v373_v19  ;;  %v741_v23 = vpop.f32.mrb[2].mxu1  ;;  %v436_v24 = vadd.f32 %v845_v14, %v413_v16  ;;  %v414_v26 = vmul.f32 %v733_v22, %v630_v12  ;;  %v344_v28 = vpop.f32.mrb[3].mxu0 }
  0xe9   : > { %v444_v25 = vadd.f32 %v845_v14, %v421_v17  ;;  %v422_v27 = vmul.f32 %v741_v23, %v630_v12  ;;  %v376_v29 = vpop.f32.mrb[3].mxu1  ;;  %v434_v30 = vadd.f32 %v845_v14, %v411_v20  ;;  %v412_v32 = vmul.f32 %v630_v12, %v344_v28 }
  0xea   : > { %v442_v31 = vadd.f32 %v845_v14, %v419_v21  ;;  %v420_v33 = vmul.f32 %v630_v12, %v376_v29  ;;  %v437_v34 = vadd.f32 %v845_v14, %v414_v26  ;;  %v452_v38 = vmax.f32 %v436_v24, 0.0 }
  0xeb   : > { %v445_v35 = vadd.f32 %v845_v14, %v422_v27  ;;  %v435_v36 = vadd.f32 %v845_v14, %v412_v32  ;;  %v460_v39 = vmax.f32 %v444_v25, 0.0  ;;  %v450_v42 = vmax.f32 %v434_v30, 0.0 }
  0xec   : > { %v443_v37 = vadd.f32 %v845_v14, %v420_v33  ;;  %v453_v40 = vmax.f32 %v437_v34, 0.0  ;;  %v458_v43 = vmax.f32 %v442_v31, 0.0 }
  0xed   : > { %v461_v41 = vmax.f32 %v445_v35, 0.0  ;;  %v451_v44 = vmax.f32 %v435_v36, 0.0  ;;  %v736_v46 = vpop.f32.mrb[4].mxu0 }
  0xee   : > { %v459_v45 = vmax.f32 %v443_v37, 0.0  ;;  %v744_v47 = vpop.f32.mrb[4].mxu1  ;;  %v674_v48 = vpack.c.bf16 %v453_v40, %v452_v38  ;;  %v417_v50 = vmul.f32 %v736_v46, %v630_v12  ;;  %v357_v52 = vpop.f32.mrb[5].mxu0 }
  0xef   : > { %v694_v49 = vpack.c.bf16 %v461_v41, %v460_v39  ;;  %v425_v51 = vmul.f32 %v744_v47, %v630_v12  ;;  %v389_v53 = vpop.f32.mrb[5].mxu1  ;;  %v669_v54 = vpack.c.bf16 %v451_v44, %v450_v42  ;;  %v415_v56 = vmul.f32 %v630_v12, %v357_v52  ;;  %v737_v58 = vpop.f32.mrb[6].mxu0 }
  0xf0   : > { %v689_v55 = vpack.c.bf16 %v459_v45, %v458_v43  ;;  %v423_v57 = vmul.f32 %v630_v12, %v389_v53  ;;  %v745_v59 = vpop.f32.mrb[6].mxu1  ;;  %706 = vst [vmem:[%s860_s8 + $0x8] sm:$0xff] %v674_v48   ;;  %v440_v60 = vadd.f32 %v845_v14, %v417_v50  ;;  %v418_v62 = vmul.f32 %v737_v58, %v630_v12  ;;  %v360_v0 = vpop.f32.mrb[7].mxu0 }
  0xf1   : > { %710 = vst [vmem:[%s860_s8 + $0x28] sm:$0xff] %v694_v49   ;;  %v448_v61 = vadd.f32 %v845_v14, %v425_v51  ;;  %v426_v63 = vmul.f32 %v745_v59, %v630_v12  ;;  %v392_v1 = vpop.f32.mrb[7].mxu1  ;;  %670 = vst [vmem:[%s860_s8] sm:$0xff] %v669_v54   ;;  %v438_v2 = vadd.f32 %v845_v14, %v415_v56 }
  0xf2   : > { %709 = vst [vmem:[%s860_s8 + $0x20] sm:$0xff] %v689_v55   ;;  %v446_v3 = vadd.f32 %v845_v14, %v423_v57  ;;  %v416_v4 = vmul.f32 %v630_v12, %v360_v0  ;;  %v424_v5 = vmul.f32 %v630_v12, %v392_v1  ;;  %v441_v6 = vadd.f32 %v845_v14, %v418_v62 }
  0xf3   : > { %v449_v7 = vadd.f32 %v845_v14, %v426_v63  ;;  %v456_v10 = vmax.f32 %v440_v60, 0.0  ;;  %v464_v11 = vmax.f32 %v448_v61, 0.0  ;;  %v454_v16 = vmax.f32 %v438_v2, 0.0 }
  0xf4   : > { %v439_v8 = vadd.f32 %v845_v14, %v416_v4  ;;  %v447_v9 = vadd.f32 %v845_v14, %v424_v5  ;;  %v457_v13 = vmax.f32 %v441_v6, 0.0  ;;  %v462_v17 = vmax.f32 %v446_v3, 0.0 }
  0xf5   : > { %v465_v15 = vmax.f32 %v449_v7, 0.0 }
  0xf6   : > { %v455_v18 = vmax.f32 %v439_v8, 0.0  ;;  %v463_v12 = vmax.f32 %v447_v9, 0.0  ;;  %v684_v19 = vpack.c.bf16 %v457_v13, %v456_v10 }
  0xf7   : > { %v704_v20 = vpack.c.bf16 %v465_v15, %v464_v11 }
  0xf8   : > { %v679_v21 = vpack.c.bf16 %v455_v18, %v454_v16  ;;  %v699_v22 = vpack.c.bf16 %v463_v12, %v462_v17  ;;  %708 = vst [vmem:[%s860_s8 + $0x18] sm:$0xff] %v684_v19  }
  0xf9   : > { %712 = vst [vmem:[%s860_s8 + $0x38] sm:$0xff] %v704_v20  }
  0xfa   : > { %707 = vst [vmem:[%s860_s8 + $0x10] sm:$0xff] %v679_v21   ;;  %711 = vst [vmem:[%s860_s8 + $0x30] sm:$0xff] %v699_v22  }
  0xfb PF: > { %s14_s15 = sadd.s32 1, %s779_s15  }
  0xfc   : > { %p11_p4 = scmp.ge.s32.totalorder %s14_s15, 6  }
  0xfe   :  { %13 = sbr.rel (!%p11_p4) target bundleno = 1 (0x1), region = 66 }

</bundles_post_ra>
